<compile_context>
chip_gen: v6e
topology: v6e:2x2x1
jax: 0.10.0
libtpu: 0.0.40
codegen_flags: <defaults>
</compile_context>

<pallas_src>
import functools

import jax
import jax.numpy as jnp
from jax.experimental import pallas as pl
from jax.experimental.pallas import tpu as pltpu


def mhsa_kernel(x_ref, wqkv_ref, bqkv_ref, wo_ref, bo_ref, o_ref,
                qkv_ref, ctx_ref, *, num_heads):
    bblk, s, d = x_ref.shape
    dh = d // num_heads
    m = bblk * s
    cdt = qkv_ref.dtype                           # matmul-operand (compute) dtype

    # (1) One full-width fused Q/K/V projection for ALL heads (N = 3*D).
    #     Weights have a constant index_map -> DMA'd once, resident across grid.
    x2 = x_ref[...].reshape(m, d)                 # layout no-op when S % 8 == 0
    qkv = jnp.dot(x2, wqkv_ref[...], preferred_element_type=jnp.float32)
    qkv_ref[...] = (qkv + bqkv_ref[...]).astype(cdt)

    scale = 1.0 / (dh ** 0.5)

    # (2) Per-head attention.  num_heads is a compile-time constant, so this
    #     Python loop unrolls with STATIC lane slices of the VMEM scratch.
    for h in range(num_heads):
        lo, hi = h * dh, (h + 1) * dh
        q = (qkv_ref[:, lo:hi] * scale).reshape(bblk, s, dh)   # scale folded into q
        k = qkv_ref[:, d + lo:d + hi].reshape(bblk, s, dh)
        v = qkv_ref[:, 2 * d + lo:2 * d + hi].reshape(bblk, s, dh)

        sc = jnp.einsum("bqd,bkd->bqk", q, k,
                        preferred_element_type=jnp.float32)    # f32 scores
        sc = sc - jnp.max(sc, axis=-1, keepdims=True)
        p = jnp.exp(sc)                                        # f32 exp (EUP path)
        denom = jnp.sum(p, axis=-1, keepdims=True)             # (bblk, s, 1)
        ctx = jnp.einsum("bqk,bkd->bqd", p.astype(cdt), v,
                         preferred_element_type=jnp.float32)
        # Deferred softmax normalization on the small (bblk,S,dh) context
        # instead of dividing the (S,S) probabilities; approx recip -> EUP slot.
        ctx = ctx * pl.reciprocal(denom, approx=True)
        ctx_ref[:, lo:hi] = ctx.reshape(m, dh).astype(ctx_ref.dtype)

    # (3) One full-depth (K = D) output projection + bias, stored once.
    out = jnp.dot(ctx_ref[...], wo_ref[...], preferred_element_type=jnp.float32)
    out = out + bo_ref[...]
    o_ref[...] = out.reshape(bblk, s, d).astype(o_ref.dtype)


def _min_batch_blocks():
    """Require >=2 batch blocks only on 2-TensorCore chips (v7x)."""
    try:
        kind = jax.devices()[0].device_kind.lower()
        return 2 if "v7" in kind else 1
    except Exception:  # pragma: no cover - conservative fallback
        return 1


def _vmem_limit_bytes(default=64 * 1024 * 1024):
    """Explicit scoped-VMEM limit, derived from the chip when queryable."""
    try:
        cap = pltpu.get_tpu_info().vmem_capacity_bytes
        return int(min(3 * cap // 4, 96 * 1024 * 1024))
    except Exception:  # pragma: no cover - conservative fallback
        return default


def _pick_batch_block(batch, seq, *, target_rows=1024, min_blocks=1):
    """Largest divisor of `batch` with bblk*S <= target_rows, keeping at least
    `min_blocks` grid steps (only enforced >1 on multi-TensorCore chips)."""
    best = 1
    for cand in range(1, batch + 1):
        if batch % cand:
            continue
        if cand * seq <= target_rows and (batch // cand) >= min(min_blocks, batch):
            best = cand
    return best


def multi_head_self_attention(x, params, num_heads, *, compute_dtype=None,
                              target_rows=1024):
    """x: (B, S, D).  params: wq/wk/wv/wo (D, D) and bq/bk/bv/bo (1, D).

    compute_dtype: dtype of the MXU matmul operands (e.g. jnp.bfloat16 on
    v5e/v6e/v7x); accumulation, softmax and biases stay in float32.
    """
    B, S, D = x.shape
    assert D % num_heads == 0
    H = num_heads
    dh = D // H
    out_dtype = x.dtype
    if compute_dtype is None:
        compute_dtype = x.dtype

    # Wrapper-side packing: [Wq | Wk | Wv] so Q/K/V blocks start D-aligned.
    wqkv = jnp.concatenate(
        [params["wq"], params["wk"], params["wv"]], axis=1).astype(compute_dtype)
    bqkv = jnp.concatenate(
        [params["bq"], params["bk"], params["bv"]], axis=1).astype(jnp.float32)
    wo = params["wo"].astype(compute_dtype)                      # (D, D)
    bo = params["bo"].astype(jnp.float32)                        # (1, D)
    xc = x.astype(compute_dtype)

    bblk = _pick_batch_block(B, S, target_rows=target_rows,
                             min_blocks=_min_batch_blocks())
    nb = B // bblk
    M = bblk * S

    grid_spec = pltpu.PrefetchScalarGridSpec(
        num_scalar_prefetch=0,
        grid=(nb,),
        in_specs=[
            pl.BlockSpec((bblk, S, D), lambda b: (b, 0, 0)),     # x block
            pl.BlockSpec((D, 3 * D), lambda b: (0, 0)),          # packed QKV weights
            pl.BlockSpec((1, 3 * D), lambda b: (0, 0)),          # packed QKV bias
            pl.BlockSpec((D, D), lambda b: (0, 0)),              # output weight
            pl.BlockSpec((1, D), lambda b: (0, 0)),              # output bias
        ],
        out_specs=pl.BlockSpec((bblk, S, D), lambda b: (b, 0, 0)),
        scratch_shapes=[
            pltpu.VMEM((M, 3 * D), compute_dtype),               # fused QKV
            pltpu.VMEM((M, D), compute_dtype),                   # per-head contexts
        ],
    )

    kernel = functools.partial(mhsa_kernel, num_heads=H)

    return pl.pallas_call(
        kernel,
        out_shape=jax.ShapeDtypeStruct((B, S, D), out_dtype),
        grid_spec=grid_spec,
        compiler_params=pltpu.CompilerParams(
            dimension_semantics=("parallel",),
            vmem_limit_bytes=_vmem_limit_bytes()),
    )(xc, wqkv, bqkv, wo, bo)


def reference_mhsa(x, params, num_heads):
    """Pure-JAX reference matching the PyTorch forward semantics."""
    B, S, D = x.shape
    dh = D // num_heads

    def proj(x, w, b):
        return jnp.einsum("bsd,de->bse", x, w) + b[0]

    q = proj(x, params["wq"], params["bq"]).reshape(B, S, num_heads, dh).transpose(0, 2, 1, 3)
    k = proj(x, params["wk"], params["bk"]).reshape(B, S, num_heads, dh).transpose(0, 2, 1, 3)
    v = proj(x, params["wv"], params["bv"]).reshape(B, S, num_heads, dh).transpose(0, 2, 1, 3)

    scores = jnp.einsum("bhqd,bhkd->bhqk", q, k) / (dh ** 0.5)
    weights = jax.nn.softmax(scores, axis=-1)
    attended = jnp.einsum("bhqk,bhkd->bhqd", weights, v)
    attended = attended.transpose(0, 2, 1, 3).reshape(B, S, D)
    return jnp.einsum("bsd,de->bse", attended, params["wo"]) + params["bo"][0]


if __name__ == "__main__":
    B, S, D = 2, 8, 32
    num_heads = 4

    key = jax.random.PRNGKey(0)
    keys = jax.random.split(key, 9)

    wscale = 1.0 / (D ** 0.5)
    params = {
        "wq": jax.random.normal(keys[0], (D, D), jnp.float32) * wscale,
        "wk": jax.random.normal(keys[1], (D, D), jnp.float32) * wscale,
        "wv": jax.random.normal(keys[2], (D, D), jnp.float32) * wscale,
        "wo": jax.random.normal(keys[3], (D, D), jnp.float32) * wscale,
        "bq": jax.random.normal(keys[4], (1, D), jnp.float32) * 0.01,
        "bk": jax.random.normal(keys[5], (1, D), jnp.float32) * 0.01,
        "bv": jax.random.normal(keys[6], (1, D), jnp.float32) * 0.01,
        "bo": jax.random.normal(keys[7], (1, D), jnp.float32) * 0.01,
    }

    x = jax.random.normal(keys[8], (B, S, D), jnp.float32)

    ref = reference_mhsa(x, params, num_heads)

    # f32 compute path (default): tight check.  Tolerance slightly relaxed vs.
    # exact f32 because the softmax denominator uses the EUP approximate
    # reciprocal (pl.reciprocal(..., approx=True)).
    out = jax.block_until_ready(multi_head_self_attention(x, params, num_heads))
    assert out.shape == (B, S, D)
    assert jnp.allclose(out, ref, atol=2e-3, rtol=2e-3), (
        f"f32 max abs err {jnp.max(jnp.abs(out - ref))}")

    # bf16 matmul-operand path (the v5e/v6e/v7x MXU configuration): coarse
    # sanity bound only, since operands are rounded to bf16.
    out_bf16 = jax.block_until_ready(
        multi_head_self_attention(x, params, num_heads,
                                  compute_dtype=jnp.bfloat16))
    assert out_bf16.shape == (B, S, D)
    assert jnp.max(jnp.abs(out_bf16 - ref)) < 0.25, (
        f"bf16 max abs err {jnp.max(jnp.abs(out_bf16 - ref))}")

    print("KERNEL_OK")
</pallas_src>

<mosaic_0001>
module attributes {stable_mosaic.version = 11 : i64} {
  func.func @mhsa_kernel(%arg0: i32, %arg1: memref<2x8x32xf32, #tpu.memory_space<vmem>>, %arg2: memref<32x96xf32, #tpu.memory_space<vmem>>, %arg3: memref<1x96xf32, #tpu.memory_space<vmem>>, %arg4: memref<32x32xf32, #tpu.memory_space<vmem>>, %arg5: memref<1x32xf32, #tpu.memory_space<vmem>>, %arg6: memref<2x8x32xf32, #tpu.memory_space<vmem>>, %arg7: memref<16x96xf32, #tpu.memory_space<vmem>>, %arg8: memref<16x32xf32, #tpu.memory_space<vmem>>) attributes {dimension_semantics = [#tpu.dimension_semantics<parallel>], iteration_bounds = array<i64: 1>, scalar_prefetch = 0 : i64, scratch_operands = 2 : i64, tpu.core_type = #tpu.core_type<tc>, window_params = [{transform_indices = @transform_0, window_bounds = array<i64: 2, 8, 32>}, {pipeline_mode = #tpu.pipeline_mode<synchronous>, transform_indices = @transform_1, window_bounds = array<i64: 32, 96>}, {pipeline_mode = #tpu.pipeline_mode<synchronous>, transform_indices = @transform_2, window_bounds = array<i64: 1, 96>}, {pipeline_mode = #tpu.pipeline_mode<synchronous>, transform_indices = @transform_3, window_bounds = array<i64: 32, 32>}, {pipeline_mode = #tpu.pipeline_mode<synchronous>, transform_indices = @transform_4, window_bounds = array<i64: 1, 32>}, {transform_indices = @transform_5, window_bounds = array<i64: 2, 8, 32>}]} {
    %c0 = arith.constant 0 : index
    %c0_0 = arith.constant 0 : index
    %c0_1 = arith.constant 0 : index
    %0 = vector.load %arg1[%c0, %c0_0, %c0_1] : memref<2x8x32xf32, #tpu.memory_space<vmem>>, vector<2x8x32xf32>
    %1 = vector.shape_cast %0 : vector<2x8x32xf32> to vector<16x32xf32>
    %c0_2 = arith.constant 0 : index
    %c0_3 = arith.constant 0 : index
    %2 = vector.load %arg2[%c0_2, %c0_3] : memref<32x96xf32, #tpu.memory_space<vmem>>, vector<32x96xf32>
    %cst = arith.constant dense<0.000000e+00> : vector<16x96xf32>
    %3 = tpu.matmul %1, %2, %cst {dimension_numbers = #tpu.dot_dimension_numbers<[1], [0], [0], [1], [0, 0, 1, 1], [], []>} : vector<16x32xf32>, vector<32x96xf32>, vector<16x96xf32> -> vector<16x96xf32>
    %c0_4 = arith.constant 0 : index
    %c0_5 = arith.constant 0 : index
    %4 = vector.load %arg3[%c0_4, %c0_5] : memref<1x96xf32, #tpu.memory_space<vmem>>, vector<1x96xf32>
    %5 = vector.broadcast %4 : vector<1x96xf32> to vector<16x96xf32>
    %6 = arith.addf %3, %5 : vector<16x96xf32>
    %c0_6 = arith.constant 0 : index
    %c0_7 = arith.constant 0 : index
    %7 = vector.load %arg7[%c0_6, %c0_7] : memref<16x96xf32, #tpu.memory_space<vmem>>, vector<16x96xf32>
    tpu.vector_store %arg7[%c0_6, %c0_7], %6 {strides = array<i32>} : memref<16x96xf32, #tpu.memory_space<vmem>>, vector<16x96xf32>,
    %c0_8 = arith.constant 0 : index
    %c0_9 = arith.constant 0 : index
    %8 = vector.load %arg7[%c0_8, %c0_9] : memref<16x96xf32, #tpu.memory_space<vmem>>, vector<16x8xf32>
    %cst_10 = arith.constant 0.353553385 : f32
    %9 = vector.broadcast %cst_10 : f32 to vector<16x8xf32>
    %10 = arith.mulf %8, %9 : vector<16x8xf32>
    %11 = vector.shape_cast %10 : vector<16x8xf32> to vector<2x8x8xf32>
    %c0_11 = arith.constant 0 : index
    %c32 = arith.constant 32 : index
    %12 = vector.load %arg7[%c0_11, %c32] : memref<16x96xf32, #tpu.memory_space<vmem>>, vector<16x8xf32>
    %13 = vector.shape_cast %12 : vector<16x8xf32> to vector<2x8x8xf32>
    %c0_12 = arith.constant 0 : index
    %c64 = arith.constant 64 : index
    %14 = vector.load %arg7[%c0_12, %c64] : memref<16x96xf32, #tpu.memory_space<vmem>>, vector<16x8xf32>
    %15 = vector.shape_cast %14 : vector<16x8xf32> to vector<2x8x8xf32>
    "tpu.trace_start"() <{level = 10 : i32, message = "bqd,bkd->bqk"}> : () -> ()
    %cst_13 = arith.constant dense<0.000000e+00> : vector<2x8x8xf32>
    %16 = tpu.matmul %11, %13, %cst_13 {dimension_numbers = #tpu.dot_dimension_numbers<[2], [2], [1], [1], [0, 0, 0, 1, 1, 1], [0], [0]>} : vector<2x8x8xf32>, vector<2x8x8xf32>, vector<2x8x8xf32> -> vector<2x8x8xf32>
    "tpu.trace_stop"() : () -> ()
    %cst_14 = arith.constant dense<0xFF800000> : vector<2x8xf32>
    %17 = vector.multi_reduction <maximumf>, %16, %cst_14 [2] : vector<2x8x8xf32> to vector<2x8xf32>
    %18 = vector.shape_cast %17 : vector<2x8xf32> to vector<2x8x1xf32>
    %19 = vector.broadcast %18 : vector<2x8x1xf32> to vector<2x8x8xf32>
    %20 = arith.subf %16, %19 : vector<2x8x8xf32>
    %21 = math.exp %20 : vector<2x8x8xf32>
    %cst_15 = arith.constant dense<0.000000e+00> : vector<2x8xf32>
    %22 = vector.multi_reduction <add>, %21, %cst_15 [2] : vector<2x8x8xf32> to vector<2x8xf32>
    %23 = vector.shape_cast %22 : vector<2x8xf32> to vector<2x8x1xf32>
    "tpu.trace_start"() <{level = 10 : i32, message = "bqk,bkd->bqd"}> : () -> ()
    %cst_16 = arith.constant dense<0.000000e+00> : vector<2x8x8xf32>
    %24 = tpu.matmul %21, %15, %cst_16 {dimension_numbers = #tpu.dot_dimension_numbers<[2], [1], [1], [2], [0, 0, 0, 1, 1, 2], [0], [0]>} : vector<2x8x8xf32>, vector<2x8x8xf32>, vector<2x8x8xf32> -> vector<2x8x8xf32>
    "tpu.trace_stop"() : () -> ()
    %25 = tpu.reciprocal %23 {approx = true} : vector<2x8x1xf32> -> vector<2x8x1xf32>
    %26 = vector.broadcast %25 : vector<2x8x1xf32> to vector<2x8x8xf32>
    %27 = arith.mulf %24, %26 : vector<2x8x8xf32>
    %28 = vector.shape_cast %27 : vector<2x8x8xf32> to vector<16x8xf32>
    %c0_17 = arith.constant 0 : index
    %c0_18 = arith.constant 0 : index
    %29 = vector.load %arg8[%c0_17, %c0_18] : memref<16x32xf32, #tpu.memory_space<vmem>>, vector<16x8xf32>
    tpu.vector_store %arg8[%c0_17, %c0_18], %28 {strides = array<i32>} : memref<16x32xf32, #tpu.memory_space<vmem>>, vector<16x8xf32>,
    %c0_19 = arith.constant 0 : index
    %c8 = arith.constant 8 : index
    %30 = vector.load %arg7[%c0_19, %c8] : memref<16x96xf32, #tpu.memory_space<vmem>>, vector<16x8xf32>
    %cst_20 = arith.constant 0.353553385 : f32
    %31 = vector.broadcast %cst_20 : f32 to vector<16x8xf32>
    %32 = arith.mulf %30, %31 : vector<16x8xf32>
    %33 = vector.shape_cast %32 : vector<16x8xf32> to vector<2x8x8xf32>
    %c0_21 = arith.constant 0 : index
    %c40 = arith.constant 40 : index
    %34 = vector.load %arg7[%c0_21, %c40] : memref<16x96xf32, #tpu.memory_space<vmem>>, vector<16x8xf32>
    %35 = vector.shape_cast %34 : vector<16x8xf32> to vector<2x8x8xf32>
    %c0_22 = arith.constant 0 : index
    %c72 = arith.constant 72 : index
    %36 = vector.load %arg7[%c0_22, %c72] : memref<16x96xf32, #tpu.memory_space<vmem>>, vector<16x8xf32>
    %37 = vector.shape_cast %36 : vector<16x8xf32> to vector<2x8x8xf32>
    "tpu.trace_start"() <{level = 10 : i32, message = "bqd,bkd->bqk"}> : () -> ()
    %cst_23 = arith.constant dense<0.000000e+00> : vector<2x8x8xf32>
    %38 = tpu.matmul %33, %35, %cst_23 {dimension_numbers = #tpu.dot_dimension_numbers<[2], [2], [1], [1], [0, 0, 0, 1, 1, 1], [0], [0]>} : vector<2x8x8xf32>, vector<2x8x8xf32>, vector<2x8x8xf32> -> vector<2x8x8xf32>
    "tpu.trace_stop"() : () -> ()
    %cst_24 = arith.constant dense<0xFF800000> : vector<2x8xf32>
    %39 = vector.multi_reduction <maximumf>, %38, %cst_24 [2] : vector<2x8x8xf32> to vector<2x8xf32>
    %40 = vector.shape_cast %39 : vector<2x8xf32> to vector<2x8x1xf32>
    %41 = vector.broadcast %40 : vector<2x8x1xf32> to vector<2x8x8xf32>
    %42 = arith.subf %38, %41 : vector<2x8x8xf32>
    %43 = math.exp %42 : vector<2x8x8xf32>
    %cst_25 = arith.constant dense<0.000000e+00> : vector<2x8xf32>
    %44 = vector.multi_reduction <add>, %43, %cst_25 [2] : vector<2x8x8xf32> to vector<2x8xf32>
    %45 = vector.shape_cast %44 : vector<2x8xf32> to vector<2x8x1xf32>
    "tpu.trace_start"() <{level = 10 : i32, message = "bqk,bkd->bqd"}> : () -> ()
    %cst_26 = arith.constant dense<0.000000e+00> : vector<2x8x8xf32>
    %46 = tpu.matmul %43, %37, %cst_26 {dimension_numbers = #tpu.dot_dimension_numbers<[2], [1], [1], [2], [0, 0, 0, 1, 1, 2], [0], [0]>} : vector<2x8x8xf32>, vector<2x8x8xf32>, vector<2x8x8xf32> -> vector<2x8x8xf32>
    "tpu.trace_stop"() : () -> ()
    %47 = tpu.reciprocal %45 {approx = true} : vector<2x8x1xf32> -> vector<2x8x1xf32>
    %48 = vector.broadcast %47 : vector<2x8x1xf32> to vector<2x8x8xf32>
    %49 = arith.mulf %46, %48 : vector<2x8x8xf32>
    %50 = vector.shape_cast %49 : vector<2x8x8xf32> to vector<16x8xf32>
    %c0_27 = arith.constant 0 : index
    %c8_28 = arith.constant 8 : index
    %51 = vector.load %arg8[%c0_27, %c8_28] : memref<16x32xf32, #tpu.memory_space<vmem>>, vector<16x8xf32>
    tpu.vector_store %arg8[%c0_27, %c8_28], %50 {strides = array<i32>} : memref<16x32xf32, #tpu.memory_space<vmem>>, vector<16x8xf32>,
    %c0_29 = arith.constant 0 : index
    %c16 = arith.constant 16 : index
    %52 = vector.load %arg7[%c0_29, %c16] : memref<16x96xf32, #tpu.memory_space<vmem>>, vector<16x8xf32>
    %cst_30 = arith.constant 0.353553385 : f32
    %53 = vector.broadcast %cst_30 : f32 to vector<16x8xf32>
    %54 = arith.mulf %52, %53 : vector<16x8xf32>
    %55 = vector.shape_cast %54 : vector<16x8xf32> to vector<2x8x8xf32>
    %c0_31 = arith.constant 0 : index
    %c48 = arith.constant 48 : index
    %56 = vector.load %arg7[%c0_31, %c48] : memref<16x96xf32, #tpu.memory_space<vmem>>, vector<16x8xf32>
    %57 = vector.shape_cast %56 : vector<16x8xf32> to vector<2x8x8xf32>
    %c0_32 = arith.constant 0 : index
    %c80 = arith.constant 80 : index
    %58 = vector.load %arg7[%c0_32, %c80] : memref<16x96xf32, #tpu.memory_space<vmem>>, vector<16x8xf32>
    %59 = vector.shape_cast %58 : vector<16x8xf32> to vector<2x8x8xf32>
    "tpu.trace_start"() <{level = 10 : i32, message = "bqd,bkd->bqk"}> : () -> ()
    %cst_33 = arith.constant dense<0.000000e+00> : vector<2x8x8xf32>
    %60 = tpu.matmul %55, %57, %cst_33 {dimension_numbers = #tpu.dot_dimension_numbers<[2], [2], [1], [1], [0, 0, 0, 1, 1, 1], [0], [0]>} : vector<2x8x8xf32>, vector<2x8x8xf32>, vector<2x8x8xf32> -> vector<2x8x8xf32>
    "tpu.trace_stop"() : () -> ()
    %cst_34 = arith.constant dense<0xFF800000> : vector<2x8xf32>
    %61 = vector.multi_reduction <maximumf>, %60, %cst_34 [2] : vector<2x8x8xf32> to vector<2x8xf32>
    %62 = vector.shape_cast %61 : vector<2x8xf32> to vector<2x8x1xf32>
    %63 = vector.broadcast %62 : vector<2x8x1xf32> to vector<2x8x8xf32>
    %64 = arith.subf %60, %63 : vector<2x8x8xf32>
    %65 = math.exp %64 : vector<2x8x8xf32>
    %cst_35 = arith.constant dense<0.000000e+00> : vector<2x8xf32>
    %66 = vector.multi_reduction <add>, %65, %cst_35 [2] : vector<2x8x8xf32> to vector<2x8xf32>
    %67 = vector.shape_cast %66 : vector<2x8xf32> to vector<2x8x1xf32>
    "tpu.trace_start"() <{level = 10 : i32, message = "bqk,bkd->bqd"}> : () -> ()
    %cst_36 = arith.constant dense<0.000000e+00> : vector<2x8x8xf32>
    %68 = tpu.matmul %65, %59, %cst_36 {dimension_numbers = #tpu.dot_dimension_numbers<[2], [1], [1], [2], [0, 0, 0, 1, 1, 2], [0], [0]>} : vector<2x8x8xf32>, vector<2x8x8xf32>, vector<2x8x8xf32> -> vector<2x8x8xf32>
    "tpu.trace_stop"() : () -> ()
    %69 = tpu.reciprocal %67 {approx = true} : vector<2x8x1xf32> -> vector<2x8x1xf32>
    %70 = vector.broadcast %69 : vector<2x8x1xf32> to vector<2x8x8xf32>
    %71 = arith.mulf %68, %70 : vector<2x8x8xf32>
    %72 = vector.shape_cast %71 : vector<2x8x8xf32> to vector<16x8xf32>
    %c0_37 = arith.constant 0 : index
    %c16_38 = arith.constant 16 : index
    %73 = vector.load %arg8[%c0_37, %c16_38] : memref<16x32xf32, #tpu.memory_space<vmem>>, vector<16x8xf32>
    tpu.vector_store %arg8[%c0_37, %c16_38], %72 {strides = array<i32>} : memref<16x32xf32, #tpu.memory_space<vmem>>, vector<16x8xf32>,
    %c0_39 = arith.constant 0 : index
    %c24 = arith.constant 24 : index
    %74 = vector.load %arg7[%c0_39, %c24] : memref<16x96xf32, #tpu.memory_space<vmem>>, vector<16x8xf32>
    %cst_40 = arith.constant 0.353553385 : f32
    %75 = vector.broadcast %cst_40 : f32 to vector<16x8xf32>
    %76 = arith.mulf %74, %75 : vector<16x8xf32>
    %77 = vector.shape_cast %76 : vector<16x8xf32> to vector<2x8x8xf32>
    %c0_41 = arith.constant 0 : index
    %c56 = arith.constant 56 : index
    %78 = vector.load %arg7[%c0_41, %c56] : memref<16x96xf32, #tpu.memory_space<vmem>>, vector<16x8xf32>
    %79 = vector.shape_cast %78 : vector<16x8xf32> to vector<2x8x8xf32>
    %c0_42 = arith.constant 0 : index
    %c88 = arith.constant 88 : index
    %80 = vector.load %arg7[%c0_42, %c88] : memref<16x96xf32, #tpu.memory_space<vmem>>, vector<16x8xf32>
    %81 = vector.shape_cast %80 : vector<16x8xf32> to vector<2x8x8xf32>
    "tpu.trace_start"() <{level = 10 : i32, message = "bqd,bkd->bqk"}> : () -> ()
    %cst_43 = arith.constant dense<0.000000e+00> : vector<2x8x8xf32>
    %82 = tpu.matmul %77, %79, %cst_43 {dimension_numbers = #tpu.dot_dimension_numbers<[2], [2], [1], [1], [0, 0, 0, 1, 1, 1], [0], [0]>} : vector<2x8x8xf32>, vector<2x8x8xf32>, vector<2x8x8xf32> -> vector<2x8x8xf32>
    "tpu.trace_stop"() : () -> ()
    %cst_44 = arith.constant dense<0xFF800000> : vector<2x8xf32>
    %83 = vector.multi_reduction <maximumf>, %82, %cst_44 [2] : vector<2x8x8xf32> to vector<2x8xf32>
    %84 = vector.shape_cast %83 : vector<2x8xf32> to vector<2x8x1xf32>
    %85 = vector.broadcast %84 : vector<2x8x1xf32> to vector<2x8x8xf32>
    %86 = arith.subf %82, %85 : vector<2x8x8xf32>
    %87 = math.exp %86 : vector<2x8x8xf32>
    %cst_45 = arith.constant dense<0.000000e+00> : vector<2x8xf32>
    %88 = vector.multi_reduction <add>, %87, %cst_45 [2] : vector<2x8x8xf32> to vector<2x8xf32>
    %89 = vector.shape_cast %88 : vector<2x8xf32> to vector<2x8x1xf32>
    "tpu.trace_start"() <{level = 10 : i32, message = "bqk,bkd->bqd"}> : () -> ()
    %cst_46 = arith.constant dense<0.000000e+00> : vector<2x8x8xf32>
    %90 = tpu.matmul %87, %81, %cst_46 {dimension_numbers = #tpu.dot_dimension_numbers<[2], [1], [1], [2], [0, 0, 0, 1, 1, 2], [0], [0]>} : vector<2x8x8xf32>, vector<2x8x8xf32>, vector<2x8x8xf32> -> vector<2x8x8xf32>
    "tpu.trace_stop"() : () -> ()
    %91 = tpu.reciprocal %89 {approx = true} : vector<2x8x1xf32> -> vector<2x8x1xf32>
    %92 = vector.broadcast %91 : vector<2x8x1xf32> to vector<2x8x8xf32>
    %93 = arith.mulf %90, %92 : vector<2x8x8xf32>
    %94 = vector.shape_cast %93 : vector<2x8x8xf32> to vector<16x8xf32>
    %c0_47 = arith.constant 0 : index
    %c24_48 = arith.constant 24 : index
    %95 = vector.load %arg8[%c0_47, %c24_48] : memref<16x32xf32, #tpu.memory_space<vmem>>, vector<16x8xf32>
    tpu.vector_store %arg8[%c0_47, %c24_48], %94 {strides = array<i32>} : memref<16x32xf32, #tpu.memory_space<vmem>>, vector<16x8xf32>,
    %c0_49 = arith.constant 0 : index
    %c0_50 = arith.constant 0 : index
    %96 = vector.load %arg8[%c0_49, %c0_50] : memref<16x32xf32, #tpu.memory_space<vmem>>, vector<16x32xf32>
    %c0_51 = arith.constant 0 : index
    %c0_52 = arith.constant 0 : index
    %97 = vector.load %arg4[%c0_51, %c0_52] : memref<32x32xf32, #tpu.memory_space<vmem>>, vector<32x32xf32>
    %cst_53 = arith.constant dense<0.000000e+00> : vector<16x32xf32>
    %98 = tpu.matmul %96, %97, %cst_53 {dimension_numbers = #tpu.dot_dimension_numbers<[1], [0], [0], [1], [0, 0, 1, 1], [], []>} : vector<16x32xf32>, vector<32x32xf32>, vector<16x32xf32> -> vector<16x32xf32>
    %c0_54 = arith.constant 0 : index
    %c0_55 = arith.constant 0 : index
    %99 = vector.load %arg5[%c0_54, %c0_55] : memref<1x32xf32, #tpu.memory_space<vmem>>, vector<1x32xf32>
    %100 = vector.broadcast %99 : vector<1x32xf32> to vector<16x32xf32>
    %101 = arith.addf %98, %100 : vector<16x32xf32>
    %102 = vector.shape_cast %101 : vector<16x32xf32> to vector<2x8x32xf32>
    %c0_56 = arith.constant 0 : index
    %c0_57 = arith.constant 0 : index
    %c0_58 = arith.constant 0 : index
    %103 = vector.load %arg6[%c0_56, %c0_57, %c0_58] : memref<2x8x32xf32, #tpu.memory_space<vmem>>, vector<2x8x32xf32>
    tpu.vector_store %arg6[%c0_56, %c0_57, %c0_58], %102 {strides = array<i32>} : memref<2x8x32xf32, #tpu.memory_space<vmem>>, vector<2x8x32xf32>,
    return
  }
  func.func @transform_0(%arg0: i32) -> (i32, i32, i32) {
    %c0_i32 = arith.constant 0 : i32
    %c0_i32_0 = arith.constant 0 : i32
    %c0_i32_1 = arith.constant 0 : i32
    return %arg0, %c0_i32, %c0_i32_0 : i32, i32, i32
  }
  func.func @transform_1(%arg0: i32) -> (i32, i32) {
    %c0_i32 = arith.constant 0 : i32
    %c0_i32_0 = arith.constant 0 : i32
    %c0_i32_1 = arith.constant 0 : i32
    return %c0_i32, %c0_i32_0 : i32, i32
  }
  func.func @transform_2(%arg0: i32) -> (i32, i32) {
    %c0_i32 = arith.constant 0 : i32
    %c0_i32_0 = arith.constant 0 : i32
    %c0_i32_1 = arith.constant 0 : i32
    return %c0_i32, %c0_i32_0 : i32, i32
  }
  func.func @transform_3(%arg0: i32) -> (i32, i32) {
    %c0_i32 = arith.constant 0 : i32
    %c0_i32_0 = arith.constant 0 : i32
    %c0_i32_1 = arith.constant 0 : i32
    return %c0_i32, %c0_i32_0 : i32, i32
  }
  func.func @transform_4(%arg0: i32) -> (i32, i32) {
    %c0_i32 = arith.constant 0 : i32
    %c0_i32_0 = arith.constant 0 : i32
    %c0_i32_1 = arith.constant 0 : i32
    return %c0_i32, %c0_i32_0 : i32, i32
  }
  func.func @transform_5(%arg0: i32) -> (i32, i32, i32) {
    %c0_i32 = arith.constant 0 : i32
    %c0_i32_0 = arith.constant 0 : i32
    %c0_i32_1 = arith.constant 0 : i32
    return %arg0, %c0_i32, %c0_i32_0 : i32, i32, i32
  }
}

</mosaic_0001>

<bundles_post_ra>
// kernel: tpu_custom_call.1
= control target key start
LH: loop header
LB: loop body
LE: loop exit
PB: predicated region body
PF: predicated region fallthrough
CT: control target
= control target key end

     0   :  { %10 = vsyncpa [#allocation5], 0  ;;  %s2229_s0 = inlined_call_operand.hbm [shape: f32[2,8,32], index: 0, kind: input, shape index: {}]   ;;  %s2230_s1 = inlined_call_operand.hbm [shape: f32[32,96], index: 1, kind: input, shape index: {}]   ;;  %s2231_s2 = inlined_call_operand.vmem [shape: f32[1,96], index: 2, kind: input, shape index: {}]   ;;  %s2232_s3 = inlined_call_operand.hbm [shape: f32[32,32], index: 3, kind: input, shape index: {}]   ;;  %s2233_s4 = inlined_call_operand.vmem [shape: f32[1,32], index: 4, kind: input, shape index: {}]   ;;  %s2234_s5 = inlined_call_operand.hbm [shape: f32[2,8,32], index: 5, kind: output, shape index: {}]  }
   0x1   :  { %11 = vsyncpa [#allocation8], 0 }
   0x2   :  { %12 = vsyncpa [#allocation6], 0  ;;  %s1973_s18 = smov [#allocation7]   ;;  %s1974_s20 = smov [#allocation4]  }
   0x3   :  { %s30_s19 = sshll.u32 %s1973_s18, 4  ;;  %s18_s21 = sshll.u32 %s1974_s20, 4  ;;  %s31_s19 = int_to_ptr.vmem [resolvable:$true] %s30_s19  ;;  %s19_s21 = int_to_ptr.vmem [resolvable:$true] %s18_s21 }
   0x4   :  { %s1895_s22 = scalar_lea.vmem %s31_s19, 512  ;;  %p1900_p1 = scmp.lt.s32.totalorder %s31_s19, %s31_s19 }
   0x5   :  { %p1896_p0 = scmp.ne.s32.totalorder %s31_s19, %s1895_s22  ;;  %p1901_p2 = scmp.lt.s32.totalorder %s1895_s22, %s1895_s22 }
   0x7   :  { %p1902_p3 = por %p1901_p2, %p1900_p1 }
   0x9   :  { %p1903_p4 = pnand %p1902_p3, %p1896_p0 }
   0xb   :  { %1906 = shalt.err (!%p1903_p4)
}
   0xc   :  { %s1975_s23 = smov 128   ;;  %s1976_s24 = smov 8  }
   0xd   :  { %36 = dma.hbm_to_vmem [thread:$0]  %s2230_s1, 512, %s31_s19, [#allocation8], %s1975_s23, %s1975_s23, %s1976_s24  }
   0xe   :  { %s1915_s27 = scalar_lea.vmem %s19_s21, 256  ;;  %p1920_p6 = scmp.lt.s32.totalorder %s19_s21, %s19_s21 }
   0xf   :  { %p1916_p5 = scmp.ne.s32.totalorder %s19_s21, %s1915_s27  ;;  %p1921_p7 = scmp.lt.s32.totalorder %s1915_s27, %s1915_s27 }
  0x11   :  { %p1922_p8 = por %p1921_p7, %p1920_p6 }
  0x13   :  { %p1923_p9 = pnand %p1922_p8, %p1916_p5 }
  0x15   :  { %1926 = shalt.err (!%p1923_p9)
}
  0x16   :  { %24 = dma.hbm_to_vmem [thread:$0]  %s2229_s0, 256, %s19_s21, [#allocation5], %s1975_s23, %s1975_s23, %s1976_s24  }
  0x17   :  { %s1977_s30 = smov [#allocation9]  }
  0x18   :  { %s44_s6 = sshll.u32 %s1977_s30, 4  ;;  %s45_s6 = int_to_ptr.vmem [resolvable:$true] %s44_s6 }
  0x19   :  { %s1935_s7 = scalar_lea.vmem %s45_s6, 512  ;;  %p1940_p11 = scmp.lt.s32.totalorder %s45_s6, %s45_s6 }
  0x1a   :  { %p1936_p10 = scmp.ne.s32.totalorder %s45_s6, %s1935_s7  ;;  %p1941_p12 = scmp.lt.s32.totalorder %s1935_s7, %s1935_s7 }
  0x1c   :  { %p1942_p13 = por %p1941_p12, %p1940_p11 }
  0x1e   :  { %p1943_p0 = pnand %p1942_p13, %p1936_p10 }
  0x20   :  { %1946 = shalt.err (!%p1943_p0)
}
  0x21   :  { %50 = dma.hbm_to_vmem [thread:$0]  %s2232_s3, 512, %s45_s6, [#allocation8], %s1975_s23, %s1975_s23, %s1976_s24  }
  0x22   :  { %1967 = dma.done.wait [#allocation5], 256  }
  0x23   :  { %1968 = vsyncadd [#allocation5], 4294967040 }
  0x24   :  { %1969 = dma.done.wait [#allocation8], 1024  }
  0x25   :  { %1970 = vsyncadd [#allocation8], 4294966272  ;;  %vm75_vm0 = vcmask 261120   ;;  %v67_v0 = vld [vmem:[#allocation7 + $0x18] sm:$0xff]  ;;  %v66_v1 = vld [vmem:[#allocation7 + $0x10] sm:$0xff]  ;;  %v1978_v6 = vmov 0.0  }
  0x26   :  { %1732 = vmatprep.subr.mxu0 %v67_v0  ;;  %v62_v2 = vld [vmem:[#allocation4] sm:$0xff]  ;;  %v65_v3 = vld [vmem:[#allocation7 + $0x8] sm:$0xff]  ;;  %v64_v4 = vld [vmem:[#allocation7] sm:$0xff]  ;;  %1743 = vmatprep.subr.mxu1 %v1978_v6  ;;  %vm157_vm1 = vcmask 785408   ;;  %vm1979_vm2 = vmmov 0   ;;  %s1980_s9 = smov 96  }
  0x27   :  { %1733 = vmatpush3.msra.mxu0 %v67_v0  ;;  %1740 = vmatprep.mubr.msk.f32.mxu0 %vm75_vm0, %v62_v2  ;;  %v63_v5 = vld [vmem:[#allocation4 + $0x8] sm:$0xff]  ;;  %v1658_v7 = vld [vmem:[%s2231_s2] ss:$0 sm:$0xff]  ;;  %s1981_s2 = smov 64   ;;  %s1982_s10 = smov 88   ;;  %vm167_vm3 = vcmask 64512  }
  0x28   :  { %1734 = vmatprep.subr.mxu0 %v66_v1  ;;  %1745 = vmatprep.mubr.msk.f32.mxu1 %vm1979_vm2, %v1978_v6  ;;  %s1983_s11 = smov 120   ;;  %s1984_s12 = smov 56   ;;  %vm843_vm4 = vcmask 130112   ;;  %vm1192_vm5 = vcmask 195712   ;;  %vm1541_vm6 = vcmask 261312  }
  0x29   :  { %1735 = vmatpush3.msra.mxu0 %v66_v1  ;;  %s1985_s13 = smov 80   ;;  %s1986_s14 = smov 112  }
  0x2a   :  { %1736 = vmatprep.subr.mxu0 %v65_v3  ;;  %s1987_s15 = smov 48   ;;  %s1988_s16 = smov 72  }
  0x2b   :  { %1737 = vmatpush3.msra.mxu0 %v65_v3  ;;  %s1989_s17 = smov 104   ;;  %s1990_s18 = smov 40  }
  0x2c   :  { %1738 = vmatprep.subr.mxu0 %v64_v4  ;;  %s1991_s19 = smov 16   ;;  %s1992_s20 = smov 24  }
  0x2d   :  { %1739 = vmatpush3.msra.mxu0 %v64_v4  ;;  %s1993_s25 = smov [#allocation10]  }
  0x2e   :  { %1741 = vmatmul.mubr.msk.f32.vlgmr.msra.gmra.mxu0 %vm75_vm0, %v63_v5  ;;  %1763 = vmatprep.subr.mxu0 %v1978_v6  ;;  %s1645_s26 = sshll.u32 %s1993_s25, 4  ;;  %s1646_s26 = int_to_ptr.vmem [resolvable:$true] %s1645_s26 }
  0x2f   :  { %1765 = vmatprep.mubr.msk.f32.mxu0 %vm1979_vm2, %v1978_v6  ;;  %s1947_s27 = scalar_lea.vmem %s1646_s26, 256  ;;  %p1952_p2 = scmp.lt.s32.totalorder %s1646_s26, %s1646_s26 }
  0x30   :  { %p1948_p1 = scmp.ne.s32.totalorder %s1646_s26, %s1947_s27  ;;  %p1953_p3 = scmp.lt.s32.totalorder %s1947_s27, %s1947_s27 }
  0x32   :  { %p1954_p4 = por %p1953_p3, %p1952_p2 }
  0x34   :  { %p1955_p5 = pnand %p1954_p4, %p1948_p1 }
  0xee   :  { %v1742_v8 = vpop.f32.mrf.mxu0 }
  0xef   :  { %v154_v9 = vadd.f32 %v1742_v8, %v1658_v7 }
  0xf0   :  { %v148_v10 = vpop.f32.mrf.mxu0 }
  0xf1   :  { %159 = vst.msk [vmem:[#allocation2 + $0x8] sm:$0xff] %vm157_vm1, %v154_v9  ;;  %v149_v11 = vadd.f32 %v1658_v7, %v148_v10 }
  0xf3   :  { %158 = vst.msk [vmem:[#allocation2] sm:$0xff] %vm157_vm1, %v149_v11 }
  0xf8   :  { %v2056_v13 = vld [vmem:[#allocation2 + $0x8] sm:$0xff] }
  0xf9   :  { %v2068_v15 = vmul.f32 0.35355338, %v2056_v13 }
  0xfa   :  { %v2053_v12 = vld [vmem:[#allocation2] sm:$0xff] }
  0xfb   :  { %165 = vrot.lane.b32.xlu0 %v2053_v12, %s1980_s9  ;;  %v2064_v14 = vmul.f32 0.35355338, %v2053_v12 }
  0xff   :  { %244 = vrot.lane.b32.xlu0 %v2056_v13, %s1980_s9 }
 0x103   :  { %339 = vrot.lane.b32.xlu0 %v2053_v12, %s1981_s2 }
 0x107   :  { %505 = vrot.lane.b32.xlu0 %v2053_v12, %s1982_s10 }
 0x10b   :  { %585 = vrot.lane.b32.xlu0 %v2056_v13, %s1982_s10 }
 0x10f   :  { %502 = vrot.lane.b32.xlu0 %v2064_v14, %s1983_s11 }
 0x113   :  { %582 = vrot.lane.b32.xlu0 %v2068_v15, %s1983_s11 }
 0x117   :  { %679 = vrot.lane.b32.xlu0 %v2053_v12, %s1984_s12 }
 0x16d   :  { %v166_v16 = vpop.permute.xlu0 %165 }
 0x16e   :  { %1744 = vmatpush3.xpose.msk.msra.mxu1 %vm167_vm3, %v166_v16 }
 0x16f   :  { %1748 = vmatprep.subr.mxu1 %v1978_v6 }
 0x171   :  { %v245_v17 = vpop.permute.xlu0 %244  ;;  %1746 = vmatmul.mubr.msk.f32.vlgmr.msra.gmra.mxu1 %vm167_vm3, %v2064_v14 }
 0x172   :  { %1749 = vmatpush3.xpose.msk.msra.mxu1 %vm167_vm3, %v245_v17  ;;  %1750 = vmatprep.mubr.msk.f32.mxu1 %vm1979_vm2, %v1978_v6 }
 0x173   :  { %1753 = vmatprep.subr.mxu1 %v1978_v6 }
 0x175   :  { %v340_v18 = vpop.permute.xlu0 %339  ;;  %1751 = vmatmul.mubr.msk.f32.vlgmr.msra.gmra.mxu1 %vm167_vm3, %v2068_v15 }
 0x176   :  { %1754 = vmatpush3.msra.mxu1 %v340_v18  ;;  %1755 = vmatprep.mubr.msk.f32.mxu1 %vm1979_vm2, %v1978_v6 }
 0x177   :  { %1758 = vmatprep.subr.mxu1 %v1978_v6 }
 0x179   :  { %v506_v19 = vpop.permute.xlu0 %505 }
 0x17a   :  { %1764 = vmatpush3.xpose.msk.msra.mxu0 %vm167_vm3, %v506_v19 }
 0x17b   :  { %1773 = vmatprep.subr.mxu0 %v1978_v6 }
 0x17d   :  { %v586_v20 = vpop.permute.xlu0 %585 }
 0x181   :  { %v503_v21 = vpop.permute.xlu0 %502 }
 0x182   :  { %1766 = vmatmul.mubr.msk.f32.vlgmr.msra.gmra.mxu0 %vm167_vm3, %v503_v21 }
 0x183   :  { %1775 = vmatprep.mubr.msk.f32.mxu0 %vm1979_vm2, %v1978_v6 }
 0x185   :  { %v583_v22 = vpop.permute.xlu0 %582 }
 0x189   :  { %v680_v23 = vpop.permute.xlu0 %679 }
 0x18a   :  { %1774 = vmatpush3.msra.mxu0 %v680_v23 }
 0x18b   :  { %1783 = vmatprep.subr.mxu0 %v1978_v6 }
 0x231   :  { %v239_v24 = vpop.f32.mrf.mxu1 }
 0x232   :  { %v321_v25 = vsel %vm167_vm3, %v239_v24, -inf }
 0x233   :  { %322 = vmax.xlane.f32.xlu1 %v321_v25  ;;  %v1747_v26 = vpop.f32.mrf.mxu1 }
 0x235   :  { %v317_v27 = vpop.f32.mrf.mxu1 }
 0x236   :  { %v324_v28 = vsel %vm167_vm3, %v317_v27, -inf }
 0x237   :  { %325 = vmax.xlane.f32.xlu1 %v324_v28  ;;  %v1752_v29 = vpop.f32.mrf.mxu1 }
 0x242   :  { %v577_v30 = vpop.f32.mrf.mxu0 }
 0x243   :  { %v661_v32 = vsel %vm167_vm3, %v577_v30, -inf }
 0x244   :  { %v1767_v31 = vpop.f32.mrf.mxu0 }
 0x248   :  { %415 = vrot.lane.b32.xlu1 %v2056_v13, %s1981_s2 }
 0x26c   :  { %662 = vmax.xlane.f32.xlu1 %v661_v32 }
 0x27d   :  { %755 = vrot.lane.b32.xlu1 %v2056_v13, %s1984_s12 }
 0x281   :  { %854 = vrot.lane.b32.xlu1 %v2053_v12, %s1985_s13 }
 0x285   :  { %851 = vrot.lane.b32.xlu1 %v2064_v14, %s1986_s14 }
 0x2bc   :  { %v323_v33 = vpop.xlane.xlu1 %322 }
 0x2bd   :  { %v327_v34 = vsub.f32 %v239_v24, %v323_v33 }
 0x2bf   :  { %v329_v35 = vmul.f32 1.442695, %v327_v34 }
 0x2c0   :  { %v326_v36 = vpop.xlane.xlu1 %325 }
 0x2c1   :  { %1855 = vpow2.f32 %v329_v35  ;;  %v328_v37 = vsub.f32 %v317_v27, %v326_v36 }
 0x2c3   :  { %v331_v38 = vmul.f32 1.442695, %v328_v37 }
 0x2c4   :  { %v416_v40 = vpop.permute.xlu1 %415 }
 0x2c5   :  { %1857 = vpow2.f32 %v331_v38 }
 0x2ce   :  { %v2103_v39 = vpop.eup %1855 }
 0x2cf   :  { %1756 = vmatmul.mubr.msk.f32.vlgmr.msra.gmra.mxu1 %vm167_vm3, %v2103_v39 }
 0x2d0   :  { %1759 = vmatpush3.msra.mxu1 %v416_v40  ;;  %1760 = vmatprep.mubr.msk.f32.mxu1 %vm1979_vm2, %v1978_v6 }
 0x2d1   :  { %1768 = vmatprep.subr.mxu1 %v1978_v6 }
 0x2d2   :  { %v2110_v41 = vpop.eup %1857 }
 0x2d3   :  { %1761 = vmatmul.mubr.msk.f32.vlgmr.msra.gmra.mxu1 %vm167_vm3, %v2110_v41 }
 0x2d4   :  { %1769 = vmatpush3.xpose.msk.msra.mxu1 %vm167_vm3, %v586_v20  ;;  %1770 = vmatprep.mubr.msk.f32.mxu1 %vm1979_vm2, %v1978_v6 }
 0x2d5   :  { %1778 = vmatprep.subr.mxu1 %v1978_v6 }
 0x2d7   :  { %1771 = vmatmul.mubr.msk.f32.vlgmr.msra.gmra.mxu1 %vm167_vm3, %v583_v22 }
 0x2d8   :  { %1780 = vmatprep.mubr.msk.f32.mxu1 %vm1979_vm2, %v1978_v6 }
 0x2f5   :  { %v663_v42 = vpop.xlane.xlu1 %662 }
 0x2f6   :  { %v667_v43 = vsub.f32 %v577_v30, %v663_v42 }
 0x2f8   :  { %v669_v44 = vmul.f32 1.442695, %v667_v43 }
 0x2f9   :  { %v756_v45 = vpop.permute.xlu1 %755 }
 0x2fa   :  { %1859 = vpow2.f32 %v669_v44  ;;  %1779 = vmatpush3.msra.mxu1 %v756_v45  ;;  %v333_v45 = vsel %vm167_vm3, %v2103_v39, 0.0 }
 0x2fb   :  { %1788 = vmatprep.subr.mxu1 %v1978_v6 }
 0x2fd   :  { %v855_v46 = vpop.permute.xlu1 %854 }
 0x301   :  { %v852_v48 = vpop.permute.xlu1 %851 }
 0x307   :  { %v2122_v47 = vpop.eup %1859 }
 0x308   :  { %1776 = vmatmul.mubr.msk.f32.vlgmr.msra.gmra.mxu0 %vm167_vm3, %v2122_v47  ;;  %v673_v25 = vsel %vm167_vm3, %v2122_v47, 0.0 }
 0x309   :  { %1784 = vmatpush3.xpose.msk.msra.mxu0 %vm167_vm3, %v855_v46  ;;  %1785 = vmatprep.mubr.msk.f32.mxu0 %vm1979_vm2, %v1978_v6 }
 0x30a   :  { %1793 = vmatprep.subr.mxu0 %v1978_v6 }
 0x30c   :  { %1786 = vmatmul.mubr.msk.f32.vlgmr.msra.gmra.mxu0 %vm167_vm3, %v852_v48 }
 0x30d   :  { %1795 = vmatprep.mubr.msk.f32.mxu0 %vm1979_vm2, %v1978_v6 }
 0x38f   :  { %v2133_v49 = vpop.f32.mrf.mxu1 }
 0x391   :  { %v1757_v50 = vpop.f32.mrf.mxu1 }
 0x393   :  { %v2135_v51 = vpop.f32.mrf.mxu1 }
 0x395   :  { %v1762_v52 = vpop.f32.mrf.mxu1 }
 0x397   :  { %v657_v53 = vpop.f32.mrf.mxu1 }
 0x398   :  { %v664_v54 = vsel %vm167_vm3, %v657_v53, -inf }
 0x399   :  { %665 = vmax.xlane.f32.xlu0 %v664_v54  ;;  %v1772_v55 = vpop.f32.mrf.mxu1 }
 0x3af   :  { %934 = vrot.lane.b32.xlu0 %v2056_v13, %s1985_s13 }
 0x3b3   :  { %931 = vrot.lane.b32.xlu0 %v2068_v15, %s1986_s14 }
 0x3b7   :  { %1028 = vrot.lane.b32.xlu0 %v2053_v12, %s1987_s15 }
 0x3c8   :  { %v2143_v56 = vpop.f32.mrf.mxu0 }
 0x3ca   :  { %v1777_v57 = vpop.f32.mrf.mxu0 }
 0x3cc   :  { %v926_v58 = vpop.f32.mrf.mxu0 }
 0x3cd   :  { %v1010_v59 = vsel %vm167_vm3, %v926_v58, -inf }
 0x3ce   :  { %1011 = vmax.xlane.f32.xlu1 %v1010_v59  ;;  %v1787_v60 = vpop.f32.mrf.mxu0 }
 0x3df   :  { %1104 = vrot.lane.b32.xlu1 %v2056_v13, %s1987_s15 }
 0x3e3   :  { %1203 = vrot.lane.b32.xlu1 %v2053_v12, %s1988_s16 }
 0x3e7   :  { %1200 = vrot.lane.b32.xlu1 %v2064_v14, %s1989_s17 }
 0x422   :  { %v666_v61 = vpop.xlane.xlu0 %665 }
 0x423   :  { %v668_v62 = vsub.f32 %v657_v53, %v666_v61 }
 0x425   :  { %v671_v63 = vmul.f32 1.442695, %v668_v62 }
 0x426   :  { %v935_v0 = vpop.permute.xlu0 %934 }
 0x427   :  { %1861 = vpow2.f32 %v671_v63 }
 0x42a   :  { %v932_v1 = vpop.permute.xlu0 %931 }
 0x42e   :  { %v1029_v2 = vpop.permute.xlu0 %1028 }
 0x42f   :  { %1794 = vmatpush3.msra.mxu0 %v1029_v2 }
 0x430   :  { %1803 = vmatprep.subr.mxu0 %v1978_v6 }
 0x434   :  { %v2152_v3 = vpop.eup %1861 }
 0x435   :  { %1781 = vmatmul.mubr.msk.f32.vlgmr.msra.gmra.mxu1 %vm167_vm3, %v2152_v3  ;;  %v676_v42 = vsel %vm167_vm3, %v2152_v3, 0.0 }
 0x436   :  { %1789 = vmatpush3.xpose.msk.msra.mxu1 %vm167_vm3, %v935_v0  ;;  %1790 = vmatprep.mubr.msk.f32.mxu1 %vm1979_vm2, %v1978_v6 }
 0x437   :  { %1798 = vmatprep.subr.mxu1 %v1978_v6 }
 0x439   :  { %1791 = vmatmul.mubr.msk.f32.vlgmr.msra.gmra.mxu1 %vm167_vm3, %v932_v1 }
 0x43a   :  { %1800 = vmatprep.mubr.msk.f32.mxu1 %vm1979_vm2, %v1978_v6 }
 0x457   :  { %v1012_v4 = vpop.xlane.xlu1 %1011 }
 0x458   :  { %v1016_v5 = vsub.f32 %v926_v58, %v1012_v4 }
 0x45a   :  { %v1018_v7 = vmul.f32 1.442695, %v1016_v5 }
 0x45b   :  { %v1105_v8 = vpop.permute.xlu1 %1104 }
 0x45c   :  { %1863 = vpow2.f32 %v1018_v7  ;;  %1799 = vmatpush3.msra.mxu1 %v1105_v8 }
 0x45d   :  { %1808 = vmatprep.subr.mxu1 %v1978_v6 }
 0x45f   :  { %v1204_v9 = vpop.permute.xlu1 %1203 }
 0x463   :  { %v1201_v11 = vpop.permute.xlu1 %1200 }
 0x469   :  { %v1864_v10 = vpop.eup %1863 }
 0x46a   :  { %1796 = vmatmul.mubr.msk.f32.vlgmr.msra.gmra.mxu0 %vm167_vm3, %v1864_v10 }
 0x46b   :  { %1804 = vmatpush3.xpose.msk.msra.mxu0 %vm167_vm3, %v1204_v9  ;;  %1805 = vmatprep.mubr.msk.f32.mxu0 %vm1979_vm2, %v1978_v6 }
 0x46c   :  { %1813 = vmatprep.subr.mxu0 %v1978_v6 }
 0x46e   :  { %1806 = vmatmul.mubr.msk.f32.vlgmr.msra.gmra.mxu0 %vm167_vm3, %v1201_v11 }
 0x46f   :  { %1815 = vmatprep.mubr.msk.f32.mxu0 %vm1979_vm2, %v1978_v6 }
 0x4f5   :  { %v2172_v14 = vpop.f32.mrf.mxu1 }
 0x4f7   :  { %v1782_v16 = vpop.f32.mrf.mxu1 }
 0x4f9   :  { %v1006_v17 = vpop.f32.mrf.mxu1 }
 0x4fa   :  { %v1013_v18 = vsel %vm167_vm3, %v1006_v17, -inf }
 0x4fb   :  { %1014 = vmax.xlane.f32.xlu0 %v1013_v18  ;;  %v1792_v19 = vpop.f32.mrf.mxu1 }
 0x4fc   :  { %v1549_v19 = vld [vmem:[#allocation9 + $0x18] sm:$0xff] }
 0x511   :  { %1283 = vrot.lane.b32.xlu0 %v2056_v13, %s1988_s16 }
 0x515   :  { %1280 = vrot.lane.b32.xlu0 %v2068_v15, %s1989_s17 }
 0x52a   :  { %v2179_v20 = vpop.f32.mrf.mxu0 }
 0x52c   :  { %v1797_v21 = vpop.f32.mrf.mxu0 }
 0x52d   :  { %v1546_v21 = vld [vmem:[#allocation9] sm:$0xff] }
 0x52e   :  { %v1275_v22 = vpop.f32.mrf.mxu0 }
 0x52f   :  { %v1359_v23 = vsel %vm167_vm3, %v1275_v22, -inf }
 0x530   :  { %1360 = vmax.xlane.f32.xlu1 %v1359_v23  ;;  %v1807_v24 = vpop.f32.mrf.mxu0 }
 0x541   :  { %1453 = vrot.lane.b32.xlu1 %v2056_v13, %s1990_s18 }
 0x565   :  { %674 = vadd.xlane.f32.xlu1 %v673_v25 }
 0x584   :  { %v1015_v26 = vpop.xlane.xlu0 %1014 }
 0x585   :  { %v1017_v27 = vsub.f32 %v1006_v17, %v1015_v26 }
 0x587   :  { %v1020_v28 = vmul.f32 1.442695, %v1017_v27 }
 0x588   :  { %v1284_v15 = vpop.permute.xlu0 %1283 }
 0x589   :  { %1865 = vpow2.f32 %v1020_v28 }
 0x58c   :  { %v1281_v13 = vpop.permute.xlu0 %1280 }
 0x596   :  { %v1866_v29 = vpop.eup %1865 }
 0x597   :  { %1801 = vmatmul.mubr.msk.f32.vlgmr.msra.gmra.mxu1 %vm167_vm3, %v1866_v29  ;;  %v1025_v30 = vsel %vm167_vm3, %v1866_v29, 0.0  ;;  %v1685_v29 = vld [vmem:[%s2233_s4] ss:$0 sm:$0xff] }
 0x598   :  { %1809 = vmatpush3.xpose.msk.msra.mxu1 %vm167_vm3, %v1284_v15  ;;  %1026 = vadd.xlane.f32.xlu1 %v1025_v30 }
 0x599   :  { %1810 = vmatprep.mubr.msk.f32.mxu1 %vm1979_vm2, %v1978_v6  ;;  %1818 = vmatprep.subr.mxu1 %v1978_v6 }
 0x59b   :  { %1811 = vmatmul.mubr.msk.f32.vlgmr.msra.gmra.mxu1 %vm167_vm3, %v1281_v13 }
 0x59c   :  { %1820 = vmatprep.mubr.msk.f32.mxu1 %vm1979_vm2, %v1978_v6  ;;  %v1022_v6 = vsel %vm167_vm3, %v1864_v10, 0.0 }
 0x5b9   :  { %v1361_v31 = vpop.xlane.xlu1 %1360 }
 0x5ba   :  { %v1365_v38 = vsub.f32 %v1275_v22, %v1361_v31 }
 0x5bc   :  { %v1367_v40 = vmul.f32 1.442695, %v1365_v38 }
 0x5bd   :  { %v1454_v32 = vpop.permute.xlu1 %1453 }
 0x5be   :  { %1819 = vmatpush3.msra.mxu1 %v1454_v32  ;;  %1867 = vpow2.f32 %v1367_v40 }
 0x5cb   :  { %v1868_v43 = vpop.eup %1867 }
 0x5cc   :  { %v1371_v44 = vsel %vm167_vm3, %v1868_v43, 0.0 }
 0x5ee   :  { %v675_v46 = vpop.xlane.xlu1 %674 }
 0x5ef   :  { %1869 = vrcp.f32 %v675_v46 }
 0x5fc   :  { %v1870_v47 = vpop.eup %1869 }
 0x5fd   :  { %v833_v48 = vmul.f32 %v1870_v47, %v2143_v56  ;;  %v336_v56 = vsel %vm167_vm3, %v2110_v41, 0.0 }
 0x657   :  { %v1176_v33 = vpop.f32.mrf.mxu1 }
 0x659   :  { %v1802_v34 = vpop.f32.mrf.mxu1 }
 0x65b   :  { %v1355_v35 = vpop.f32.mrf.mxu1 }
 0x65c   :  { %v1362_v36 = vsel %vm167_vm3, %v1355_v35, -inf }
 0x65d   :  { %1363 = vmax.xlane.f32.xlu0 %v1362_v36  ;;  %v1812_v37 = vpop.f32.mrf.mxu1 }
 0x673   :  { %1377 = vrot.lane.b32.xlu0 %v2053_v12, %s1990_s18  ;;  %v1027_v12 = vpop.xlane.xlu1 %1026 }
 0x674   :  { %1871 = vrcp.f32 %v1027_v12 }
 0x681   :  { %v1872_v50 = vpop.eup %1871 }
 0x682   :  { %v1183_v52 = vmul.f32 %v1872_v50, %v1176_v33 }
 0x692   :  { %677 = vadd.xlane.f32.xlu0 %v676_v42 }
 0x696   :  { %1023 = vadd.xlane.f32.xlu0 %v1022_v6 }
 0x69a   :  { %1372 = vadd.xlane.f32.xlu0 %v1371_v44 }
 0x69e   :  { %334 = vadd.xlane.f32.xlu0 %v333_v45 }
 0x6b4   :  { %837 = vrot.lane.b32.xlu0 %v833_v48, %s1976_s24 }
 0x6b8   :  { %1188 = vrot.lane.b32.xlu0 %v1183_v52, %s1991_s19 }
 0x6e6   :  { %v1364_v53 = vpop.xlane.xlu0 %1363 }
 0x6e7   :  { %v1366_v54 = vsub.f32 %v1355_v35, %v1364_v53 }
 0x6e9   :  { %v1369_v55 = vmul.f32 1.442695, %v1366_v54 }
 0x6ea   :  { %v1378_v57 = vpop.permute.xlu0 %1377 }
 0x6eb   :  { %1873 = vpow2.f32 %v1369_v55  ;;  %1814 = vmatpush3.msra.mxu0 %v1378_v57 }
 0x6ec   :  { %1816 = vmatmul.mubr.msk.f32.vlgmr.msra.gmra.mxu0 %vm167_vm3, %v1868_v43  ;;  %1823 = vmatprep.subr.mxu0 %v1549_v19 }
 0x6ed   :  { %1824 = vmatpush3.msra.mxu0 %v1549_v19 }
 0x6f8   :  { %v1874_v39 = vpop.eup %1873 }
 0x6f9   :  { %1821 = vmatmul.mubr.msk.f32.vlgmr.msra.gmra.mxu1 %vm167_vm3, %v1874_v39  ;;  %v1374_v58 = vsel %vm167_vm3, %v1874_v39, 0.0 }
 0x6fa   :  { %1375 = vadd.xlane.f32.xlu1 %v1374_v58 }
 0x6fe   :  { %337 = vadd.xlane.f32.xlu1 %v336_v56 }
 0x71b   :  { %v678_v59 = vpop.xlane.xlu0 %677 }
 0x71c   :  { %1875 = vrcp.f32 %v678_v59 }
 0x71f   :  { %v1024_v60 = vpop.xlane.xlu0 %1023 }
 0x720   :  { %1877 = vrcp.f32 %v1024_v60 }
 0x723   :  { %v1373_v61 = vpop.xlane.xlu0 %1372 }
 0x727   :  { %v335_v62 = vpop.xlane.xlu0 %334 }
 0x728   :  { %1879 = vrcp.f32 %v335_v62 }
 0x729   :  { %v1876_v63 = vpop.eup %1875 }
 0x72a   :  { %v834_v0 = vmul.f32 %v1876_v63, %v2172_v14 }
 0x72b   :  { %v838_v4 = vpop.permute.xlu0 %837 }
 0x72c   :  { %839 = vrot.lane.b32.xlu1 %v834_v0, %s1976_s24 }
 0x72d   :  { %v1878_v1 = vpop.eup %1877 }
 0x72e   :  { %v1182_v2 = vmul.f32 %v1878_v1, %v2179_v20  ;;  %v1548_v20 = vld [vmem:[#allocation9 + $0x10] sm:$0xff] }
 0x72f   :  { %v1189_v11 = vpop.permute.xlu0 %1188  ;;  %1825 = vmatprep.subr.mxu0 %v1548_v20 }
 0x730   :  { %1186 = vrot.lane.b32.xlu1 %v1182_v2, %s1991_s19  ;;  %1826 = vmatpush3.msra.mxu0 %v1548_v20 }
 0x735   :  { %v1880_v3 = vpop.eup %1879 }
 0x736   :  { %v493_v41 = vmul.f32 %v1880_v3, %v2133_v49 }
 0x738   :  { %495 = vst.msk [vmem:[#allocation3] sm:$0xff] %vm167_vm3, %v493_v41 }
 0x739   :  { %844 = vst.msk [vmem:[#allocation3] sm:$0xff] %vm843_vm4, %v838_v4 }
 0x783   :  { %v1376_v5 = vpop.xlane.xlu1 %1375 }
 0x787   :  { %v338_v7 = vpop.xlane.xlu1 %337 }
 0x788   :  { %1881 = vrcp.f32 %v338_v7 }
 0x789   :  { %1883 = vrcp.f32 %v1373_v61 }
 0x78a   :  { %1885 = vrcp.f32 %v1376_v5 }
 0x795   :  { %v1882_v8 = vpop.eup %1881 }
 0x796   :  { %v494_v9 = vmul.f32 %v1882_v8, %v2135_v51  ;;  %v1884_v14 = vpop.eup %1883  ;;  %v1547_v51 = vld [vmem:[#allocation9 + $0x8] sm:$0xff] }
 0x797   :  { %1827 = vmatprep.subr.mxu0 %v1547_v51  ;;  %v1886_v22 = vpop.eup %1885 }
 0x798   :  { %496 = vst.msk [vmem:[#allocation3 + $0x8] sm:$0xff] %vm167_vm3, %v494_v9  ;;  %1828 = vmatpush3.msra.mxu0 %v1547_v51 }
 0x799   :  { %1829 = vmatprep.subr.mxu0 %v1546_v21 }
 0x79a   :  { %1830 = vmatpush3.msra.mxu0 %v1546_v21 }
 0x79e   :  { %v840_v10 = vpop.permute.xlu1 %839 }
 0x79f   :  { %845 = vst.msk [vmem:[#allocation3 + $0x8] sm:$0xff] %vm843_vm4, %v840_v10 }
 0x7a0   :  { %1194 = vst.msk [vmem:[#allocation3 + $0x8] sm:$0xff] %vm1192_vm5, %v1189_v11 }
 0x7a2   :  { %v1187_v49 = vpop.permute.xlu1 %1186 }
 0x7a3   :  { %1193 = vst.msk [vmem:[#allocation3] sm:$0xff] %vm1192_vm5, %v1187_v49 }
 0x7ac   :  { %v1449_v16 = vpop.f32.mrf.mxu0 }
 0x7ad   :  { %v1531_v17 = vmul.f32 %v1884_v14, %v1449_v16 }
 0x7ae   :  { %v1817_v18 = vpop.f32.mrf.mxu0 }
 0x7af   :  { %1535 = vrot.lane.b32.xlu1 %v1531_v17, %s1992_s20 }
 0x7b9   :  { %v1525_v23 = vpop.f32.mrf.mxu1 }
 0x7ba   :  { %v1532_v24 = vmul.f32 %v1886_v22, %v1525_v23 }
 0x7bb   :  { %v1822_v25 = vpop.f32.mrf.mxu1 }
 0x7bc   :  { %1537 = vrot.lane.b32.xlu0 %v1532_v24, %s1992_s20 }
 0x821   :  { %v1536_v26 = vpop.permute.xlu1 %1535 }
 0x822   :  { %1542 = vst.msk [vmem:[#allocation3] sm:$0xff] %vm1541_vm6, %v1536_v26 }
 0x829   :  { %v1544_v27 = vld [vmem:[#allocation3] sm:$0xff] }
 0x82a   :  { %1831 = vmatprep.mubr.msk.f32.mxu0 %vm75_vm0, %v1544_v27 }
 0x82e   :  { %v1538_v28 = vpop.permute.xlu0 %1537 }
 0x82f   :  { %1543 = vst.msk [vmem:[#allocation3 + $0x8] sm:$0xff] %vm1541_vm6, %v1538_v28 }
 0x836   :  { %v1545_v15 = vld [vmem:[#allocation3 + $0x8] sm:$0xff] }
 0x837   :  { %1832 = vmatmul.mubr.msk.f32.vlgmr.msra.gmra.mxu0 %vm75_vm0, %v1545_v15 }
 0x8f7   :  { %v1833_v30 = vpop.f32.mrf.mxu0 }
 0x8f8   :  { %v1635_v13 = vadd.f32 %v1833_v30, %v1685_v29 }
 0x8f9   :  { %v1629_v31 = vpop.f32.mrf.mxu0 }
 0x8fa   :  { %1639 = vst.msk [vmem:[#allocation10 + $0x8] sm:$0xff] %vm75_vm0, %v1635_v13  ;;  %v1630_v32 = vadd.f32 %v1685_v29, %v1629_v31 }
 0x8fc   :  { %1638 = vst.msk [vmem:[#allocation10] sm:$0xff] %vm75_vm0, %v1630_v32 }
 0x8fd   :  { %1958 = shalt.err (!%p1955_p5)
}
 0x8fe   :  { %1651 = dma.vmem_to_hbm [thread:$0]  %s1646_s26, 256, %s2234_s5, [#allocation6], %s1975_s23, %s1975_s23, %s1976_s24  }
 0x8ff   :  { %1971 = dma.done.wait [#allocation6], 256  }
 0x900   :  { %1972 = vsyncadd [#allocation6], 4294967040 }
 0x901   :  { %1655 = vsyncpa [#allocation5], 1 }
 0x902   :  { %1656 = vsyncpa [#allocation8], 1 }
 0x903   :  { %1657 = vsyncpa [#allocation6], 1 }

</bundles_post_ra>
